<compile_context>
chip_gen: v5e
topology: v5e:2x2
jax: 0.10.0
libtpu: 0.0.40
codegen_flags: <defaults>
</compile_context>

<pallas_src>
import jax
import jax.numpy as jnp
from jax.experimental import pallas as pl
from jax.experimental.pallas import tpu as pltpu

_LANES = 1024  # lane-dense last dim (multiple of 128 -> unmasked vector stores)


def _swish_kernel(x_ref, o_ref):
    x = x_ref[...].astype(jnp.float32)
    # Single-transcendental sigmoid; tanh saturates so no clamp is needed.
    sig = 0.5 * jnp.tanh(0.5 * x) + 0.5
    o_ref[...] = (x * sig).astype(o_ref.dtype)


def _round_up(a, m):
    return -(-a // m) * m


def swish(x: jax.Array) -> jax.Array:
    orig_shape = x.shape
    dtype = x.dtype
    total = x.size
    if total == 0:
        return x

    itemsize = jnp.dtype(dtype).itemsize
    # Native sublane tile height: 8 rows for f32, 16 for bf16, 32 for int8/fp8.
    sub = max(8, 32 // itemsize)

    # Minimal padding: only to the next multiple of the lane width (<= 1023
    # elements); ragged row counts are left to Pallas block masking.
    rows = -(-total // _LANES)
    padded_total = rows * _LANES

    flat = x.reshape(total)
    if padded_total != total:
        # swish(0) == 0; the padded tail is sliced off below.
        flat = jnp.pad(flat, (0, padded_total - total))
    x2d = flat.reshape(rows, _LANES)

    # ~8 MiB per block (dtype-aware rows), rounded to the native sublane tile.
    target_rows = max(sub, ((8 * 1024 * 1024) // (_LANES * itemsize)) // sub * sub)
    if rows <= sub:
        # Full-extent block: allowed even when rows is not 8-aligned.
        tile_rows = rows
    else:
        tile_rows = min(target_rows, _round_up(rows, sub))
        # v7x has two TensorCores; with "parallel" semantics the grid is
        # sharded across them, so ensure >= 2 blocks when splittable.
        if rows >= 2 * sub and pl.cdiv(rows, tile_rows) < 2:
            tile_rows = max(sub, _round_up(pl.cdiv(rows, 2), sub))
    grid = (pl.cdiv(rows, tile_rows),)

    out2d = pl.pallas_call(
        _swish_kernel,
        out_shape=jax.ShapeDtypeStruct((rows, _LANES), dtype),
        grid=grid,
        in_specs=[pl.BlockSpec((tile_rows, _LANES), lambda i: (i, 0))],
        out_specs=pl.BlockSpec((tile_rows, _LANES), lambda i: (i, 0)),
        compiler_params=pltpu.CompilerParams(
            dimension_semantics=("parallel",),
            # 2 bufs x (in + out) x 8 MiB ~= 32 MiB; 48 MiB leaves headroom on
            # v7x (64 MiB physical) and raises v5e/v6e scoped defaults.
            vmem_limit_bytes=48 * 1024 * 1024,
        ),
    )(x2d)

    out_flat = out2d.reshape(padded_total)
    if padded_total != total:
        out_flat = out_flat[:total]
    return out_flat.reshape(orig_shape)


if __name__ == "__main__":
    key = jax.random.PRNGKey(0)
    # NCHW input consistent with typical conv-net usage of Swish.
    x = jax.random.normal(key, (2, 4, 16, 16), dtype=jnp.float32)

    y = jax.block_until_ready(swish(x))
    ref = x * jax.nn.sigmoid(x)
    assert y.shape == x.shape and y.dtype == x.dtype
    assert jnp.allclose(y, ref, atol=1e-5, rtol=1e-5), float(jnp.max(jnp.abs(y - ref)))

    # bf16 storage (f32 compute inside the kernel, bf16 load/store).
    xb = x.astype(jnp.bfloat16)
    yb = jax.block_until_ready(swish(xb))
    refb = (xb.astype(jnp.float32) * jax.nn.sigmoid(xb.astype(jnp.float32))).astype(
        jnp.bfloat16
    )
    assert yb.shape == xb.shape and yb.dtype == jnp.bfloat16
    assert jnp.allclose(
        yb.astype(jnp.float32), refb.astype(jnp.float32), atol=2e-2, rtol=2e-2
    )

    # Lane-misaligned total: exercises the minimal-pad path.
    x3 = jax.random.normal(jax.random.PRNGKey(0), (3, 5, 7, 11), dtype=jnp.float32)
    y3 = jax.block_until_ready(swish(x3))
    assert jnp.allclose(y3, x3 * jax.nn.sigmoid(x3), atol=1e-5, rtol=1e-5)

    # Multi-block grid with a ragged (masked) last block.
    x4 = jax.random.normal(jax.random.PRNGKey(0), (2, 4, 64, 40), dtype=jnp.float32)
    y4 = jax.block_until_ready(swish(x4))
    assert jnp.allclose(y4, x4 * jax.nn.sigmoid(x4), atol=1e-5, rtol=1e-5)

    print("KERNEL_OK")
</pallas_src>

<mosaic_0001>
module attributes {stable_mosaic.version = 11 : i64} {
  func.func @_swish_kernel(%arg0: i32, %arg1: memref<2x1024xf32, #tpu.memory_space<vmem>>, %arg2: memref<2x1024xf32, #tpu.memory_space<vmem>>) attributes {dimension_semantics = [#tpu.dimension_semantics<parallel>], iteration_bounds = array<i64: 1>, scalar_prefetch = 0 : i64, scratch_operands = 0 : i64, tpu.core_type = #tpu.core_type<tc>, window_params = [{transform_indices = @transform_0, window_bounds = array<i64: 2, 1024>}, {transform_indices = @transform_1, window_bounds = array<i64: 2, 1024>}]} {
    %c0 = arith.constant 0 : index
    %c0_0 = arith.constant 0 : index
    %0 = vector.load %arg1[%c0, %c0_0] : memref<2x1024xf32, #tpu.memory_space<vmem>>, vector<2x1024xf32>
    %cst = arith.constant 5.000000e-01 : f32
    %1 = vector.broadcast %cst : f32 to vector<2x1024xf32>
    %2 = arith.mulf %1, %0 : vector<2x1024xf32>
    %3 = math.tanh %2 : vector<2x1024xf32>
    %cst_1 = arith.constant 5.000000e-01 : f32
    %4 = vector.broadcast %cst_1 : f32 to vector<2x1024xf32>
    %5 = arith.mulf %4, %3 : vector<2x1024xf32>
    %cst_2 = arith.constant 5.000000e-01 : f32
    %6 = vector.broadcast %cst_2 : f32 to vector<2x1024xf32>
    %7 = arith.addf %5, %6 : vector<2x1024xf32>
    %8 = arith.mulf %0, %7 : vector<2x1024xf32>
    %c0_3 = arith.constant 0 : index
    %c0_4 = arith.constant 0 : index
    %9 = vector.load %arg2[%c0_3, %c0_4] : memref<2x1024xf32, #tpu.memory_space<vmem>>, vector<2x1024xf32>
    tpu.vector_store %arg2[%c0_3, %c0_4], %8 {strides = array<i32>} : memref<2x1024xf32, #tpu.memory_space<vmem>>, vector<2x1024xf32>,
    return
  }
  func.func @transform_0(%arg0: i32) -> (i32, i32) {
    %c0_i32 = arith.constant 0 : i32
    %c0_i32_0 = arith.constant 0 : i32
    return %arg0, %c0_i32 : i32, i32
  }
  func.func @transform_1(%arg0: i32) -> (i32, i32) {
    %c0_i32 = arith.constant 0 : i32
    %c0_i32_0 = arith.constant 0 : i32
    return %arg0, %c0_i32 : i32, i32
  }
}

</mosaic_0001>

<bundles_post_ra>
// kernel: tpu_custom_call.1
= control target key start
LH: loop header
LB: loop body
LE: loop exit
PB: predicated region body
PF: predicated region fallthrough
CT: control target
= control target key end

     0   :  { %6 = vsyncpa [#allocation3], 0  ;;  %s130_s0 = inlined_call_operand.hbm [shape: f32[2,1024], index: 0, kind: input, shape index: {}]   ;;  %s131_s1 = inlined_call_operand.hbm [shape: f32[2,1024], index: 1, kind: output, shape index: {}]  }
   0x1   :  { %7 = vsyncpa [#allocation4], 0  ;;  %s13_s8 = sshll.u32 %s130_s0, 4  ;;  %s112_s9 = smov [#allocation2]   ;;  %s14_s8 = int_to_ptr.hbm [resolvable:$true] %s13_s8 }
   0x2   :  { %s15_s10 = sshll.u32 %s112_s9, 4  ;;  %s16_s10 = int_to_ptr.vmem [resolvable:$true] %s15_s10 }
   0x3   :  { %18 = dma.hbm_to_vmem [thread:$0]  %s14_s8, 256, %s16_s10, [#allocation3]  }
   0x4   :  { %108 = dma.done.wait [#allocation3], 256  }
   0x5   :  { %109 = vsyncadd [#allocation3], 4294967040  ;;  %v23_v0 = vld [vmem:[#allocation2] sm:$0xff]  ;;  %v24_v1 = vld [vmem:[#allocation2 + $0x8] sm:$0xff]  ;;  %s113_s11 = smov [#allocation5]   ;;  %s44_s14 = sshll.u32 %s131_s1, 4  ;;  %s45_s14 = int_to_ptr.hbm [resolvable:$true] %s44_s14 }
   0x6   :  { %v25_v2 = vmul.f32 0.5, %v23_v0  ;;  %v26_v3 = vmul.f32 0.5, %v24_v1  ;;  %s42_s0 = sshll.u32 %s113_s11, 4  ;;  %s43_s0 = int_to_ptr.vmem [resolvable:$true] %s42_s0 }
   0x8   :  { %56 = vtanh.f32 %v25_v2 }
   0x9   :  { %58 = vtanh.f32 %v26_v3 }
   0xe   :  { %v57_v4 = vpop.eup %56 }
   0xf   :  { %v59_v5 = vpop.eup %58  ;;  %v29_v6 = vmul.f32 0.5, %v57_v4 }
  0x10   :  { %v30_v7 = vmul.f32 0.5, %v59_v5 }
  0x11   :  { %v31_v8 = vadd.f32 0.5, %v29_v6 }
  0x12   :  { %v32_v9 = vadd.f32 0.5, %v30_v7 }
  0x13   :  { %v33_v10 = vmul.f32 %v31_v8, %v23_v0 }
  0x14   :  { %v34_v11 = vmul.f32 %v32_v9, %v24_v1 }
  0x15   :  { %35 = vst [vmem:[#allocation5] sm:$0xff] %v33_v10 }
  0x16   :  { %36 = vst [vmem:[#allocation5 + $0x8] sm:$0xff] %v34_v11 }
  0x17   :  { %47 = dma.vmem_to_hbm [thread:$0]  %s43_s0, 256, %s45_s14, [#allocation4]  }
  0x18   :  { %110 = dma.done.wait [#allocation4], 256  }
  0x19   :  { %111 = vsyncadd [#allocation4], 4294967040 }
  0x1a   :  { %52 = vsyncpa [#allocation3], 1 }
  0x1b   :  { %53 = vsyncpa [#allocation4], 1 }

</bundles_post_ra>
